<compile_context>
chip_gen: v6e
topology: v6e:2x2x1
jax: 0.10.0
libtpu: 0.0.40
codegen_flags: <defaults>
</compile_context>

<pallas_src>
import jax
import jax.numpy as jnp
from jax.experimental import pallas as pl
from jax.experimental.pallas import tpu as pltpu


LANES = 128
# Round block rows to 32 so the second-to-last block dim satisfies every
# dtype's native sublane tiling (f32: 8, bf16: 16, int8/uint8: 32).  Free for
# f32, required for the fused uint8 path.
ROW_ALIGN = 32
# ~6 MiB of *output* per block.  With input + output double-buffered the
# resident footprint is <= 4 x 6 MiB = 24 MiB.
TARGET_BLOCK_BYTES = 6 * 1024 * 1024
# Above the 16/32 MiB scoped defaults, below v7x's 64 MiB per-TC physical VMEM.
VMEM_LIMIT_BYTES = 40 * 1024 * 1024


def _make_scale_kernel(scale):
    # `scale` is a fixed constructor constant in the original nn.Module, so it
    # is baked in as a VPU immediate (free filler in a memory-bound kernel).
    # If scale ever becomes dynamic, pass it via an SMEM scalar instead to
    # avoid one recompile per distinct value.
    scale = float(scale)

    def scale_kernel(x_ref, o_ref):
        # Fused load -> (dtype cast if needed) -> scale -> store.  For uint8
        # frames the int->float conversion happens here, in the same HBM pass.
        x = x_ref[...].astype(jnp.float32)
        o_ref[...] = (x * scale).astype(o_ref.dtype)

    return scale_kernel


def _scale_slab(slab, scale, out_dtype):
    """Run the kernel over a lane-dense 2D slab (rows, width), width % 128 == 0."""
    rows, width = slab.shape
    in_itemsize = jnp.dtype(slab.dtype).itemsize
    out_itemsize = jnp.dtype(out_dtype).itemsize
    bytes_per_row = width * max(in_itemsize, out_itemsize)

    block_rows = (TARGET_BLOCK_BYTES // bytes_per_row) // ROW_ALIGN * ROW_ALIGN
    block_rows = max(ROW_ALIGN, block_rows)
    # If this clips, the block equals the full row extent, which is a legal
    # block shape for any dtype packing.
    block_rows = min(rows, block_rows)
    grid = (pl.cdiv(rows, block_rows),)  # partial last block is masked by Pallas

    return pl.pallas_call(
        _make_scale_kernel(scale),
        out_shape=jax.ShapeDtypeStruct((rows, width), out_dtype),
        grid_spec=pltpu.PrefetchScalarGridSpec(
            num_scalar_prefetch=0,
            grid=grid,
            in_specs=[pl.BlockSpec((block_rows, width), lambda i: (i, 0))],
            out_specs=pl.BlockSpec((block_rows, width), lambda i: (i, 0)),
        ),
        compiler_params=pltpu.CompilerParams(
            # 1-D "parallel" grid -> v7x shards blocks across its 2 TensorCores.
            dimension_semantics=("parallel",),
            vmem_limit_bytes=VMEM_LIMIT_BYTES,
        ),
    )(slab)


def scale_pallas(x, scale):
    """Elementwise x * scale (the `Scale` module forward) as a Pallas TPU kernel."""
    # Match torch type promotion: float tensor * python float keeps its dtype;
    # int tensor * python float promotes to float32.
    if jnp.issubdtype(x.dtype, jnp.floating) and jnp.dtype(x.dtype).itemsize <= 4:
        in_arr = x
        out_dtype = x.dtype
    elif jnp.issubdtype(x.dtype, jnp.integer) and jnp.dtype(x.dtype).itemsize <= 4:
        # Keep the raw integer bytes; the int->f32 cast is fused in-kernel.
        in_arr = x
        out_dtype = jnp.float32
    else:
        # bool / 64-bit etc. (rare): cast in the wrapper.
        in_arr = x.astype(jnp.float32)
        out_dtype = jnp.float32

    orig_shape = x.shape
    flat = in_arr.reshape(-1)  # contiguous flatten: layout bitcast, no extra HBM pass
    n = flat.shape[0]

    # Lane-dense factorization that divides n exactly -> zero padding / copies.
    width = None
    for w in (2048, 1024, 512, 256, 128):
        if n % w == 0:
            width = w
            break

    if width is None or n == 0:
        # Rare fallback (element count not a multiple of 128).  One fused XLA
        # elementwise pass (read + write once) is already optimal for this
        # memory-bound op; pad+slice or prefix+concat would double the traffic.
        out = (in_arr.astype(jnp.float32) * scale).astype(out_dtype)
        return out.reshape(orig_shape)

    out = _scale_slab(flat.reshape(n // width, width), scale, out_dtype)
    return out.reshape(orig_shape)


if __name__ == "__main__":
    key = jax.random.PRNGKey(0)
    k1, k2, k3 = jax.random.split(key, 3)
    scale = 1.0 / 255.0  # typical pixel-scaling constant used with Scale()

    # 1) float32 NCHW input (main path, f32 -> f32).
    x_f32 = jax.random.normal(k1, (2, 4, 16, 16), dtype=jnp.float32)
    y_f32 = jax.block_until_ready(scale_pallas(x_f32, scale))
    ref_f32 = x_f32 * scale
    assert y_f32.shape == x_f32.shape and y_f32.dtype == x_f32.dtype
    assert jnp.allclose(y_f32, ref_f32, atol=1e-6, rtol=1e-6)

    # 2) uint8 frame input (fused cast path, u8 -> f32, like torch promotion).
    x_u8 = jax.random.randint(k2, (2, 4, 16, 16), 0, 256, dtype=jnp.int32).astype(jnp.uint8)
    y_u8 = jax.block_until_ready(scale_pallas(x_u8, scale))
    ref_u8 = x_u8.astype(jnp.float32) * scale
    assert y_u8.shape == x_u8.shape and y_u8.dtype == jnp.float32
    assert jnp.allclose(y_u8, ref_u8, atol=1e-6, rtol=1e-6)

    # 3) odd element count (fallback path, single fused XLA pass).
    x_odd = jax.random.normal(k3, (3, 5, 7), dtype=jnp.float32)
    y_odd = jax.block_until_ready(scale_pallas(x_odd, scale))
    assert jnp.allclose(y_odd, x_odd * scale, atol=1e-6, rtol=1e-6)

    print("KERNEL_OK")
</pallas_src>

<mosaic_0001>
module attributes {stable_mosaic.version = 11 : i64} {
  func.func @scale_kernel(%arg0: i32, %arg1: memref<1x2048xf32, #tpu.memory_space<vmem>>, %arg2: memref<1x2048xf32, #tpu.memory_space<vmem>>) attributes {dimension_semantics = [#tpu.dimension_semantics<parallel>], iteration_bounds = array<i64: 1>, scalar_prefetch = 0 : i64, scratch_operands = 0 : i64, tpu.core_type = #tpu.core_type<tc>, window_params = [{transform_indices = @transform_0, window_bounds = array<i64: 1, 2048>}, {transform_indices = @transform_1, window_bounds = array<i64: 1, 2048>}]} {
    %c0 = arith.constant 0 : index
    %c0_0 = arith.constant 0 : index
    %0 = vector.load %arg1[%c0, %c0_0] : memref<1x2048xf32, #tpu.memory_space<vmem>>, vector<1x2048xf32>
    %cst = arith.constant 0.00392156886 : f32
    %1 = vector.broadcast %cst : f32 to vector<1x2048xf32>
    %2 = arith.mulf %0, %1 : vector<1x2048xf32>
    %c0_1 = arith.constant 0 : index
    %c0_2 = arith.constant 0 : index
    %3 = vector.load %arg2[%c0_1, %c0_2] : memref<1x2048xf32, #tpu.memory_space<vmem>>, vector<1x2048xf32>
    tpu.vector_store %arg2[%c0_1, %c0_2], %2 {strides = array<i32>} : memref<1x2048xf32, #tpu.memory_space<vmem>>, vector<1x2048xf32>,
    return
  }
  func.func @transform_0(%arg0: i32) -> (i32, i32) {
    %c0_i32 = arith.constant 0 : i32
    %c0_i32_0 = arith.constant 0 : i32
    return %arg0, %c0_i32 : i32, i32
  }
  func.func @transform_1(%arg0: i32) -> (i32, i32) {
    %c0_i32 = arith.constant 0 : i32
    %c0_i32_0 = arith.constant 0 : i32
    return %arg0, %c0_i32 : i32, i32
  }
}

</mosaic_0001>

<bundles_post_ra>
// kernel: tpu_custom_call.1
= control target key start
LH: loop header
LB: loop body
LE: loop exit
PB: predicated region body
PF: predicated region fallthrough
CT: control target
= control target key end

     0   :  { %6 = vsyncpa [#allocation3], 0  ;;  %s106_s0 = inlined_call_operand.hbm [shape: f32[1,2048], index: 0, kind: input, shape index: {}]   ;;  %s107_s1 = inlined_call_operand.hbm [shape: f32[1,2048], index: 1, kind: output, shape index: {}]  }
   0x1   :  { %7 = vsyncpa [#allocation4], 0  ;;  %s88_s6 = smov [#allocation2]  }
   0x2   :  { %s14_s7 = sshll.u32 %s88_s6, 4  ;;  %s15_s7 = int_to_ptr.vmem [resolvable:$true] %s14_s7 }
   0x3   :  { %s52_s8 = scalar_lea.vmem %s15_s7, 256  ;;  %p57_p1 = scmp.lt.s32.totalorder %s15_s7, %s15_s7 }
   0x4   :  { %p53_p0 = scmp.ne.s32.totalorder %s15_s7, %s52_s8  ;;  %p58_p2 = scmp.lt.s32.totalorder %s52_s8, %s52_s8 }
   0x6   :  { %p59_p3 = por %p58_p2, %p57_p1 }
   0x8   :  { %p60_p4 = pnand %p59_p3, %p53_p0 }
   0xa   :  { %63 = shalt.err (!%p60_p4)
}
   0xb   :  { %17 = dma.hbm_to_vmem [thread:$0]  %s106_s0, 256, %s15_s7, [#allocation3]  }
   0xc   :  { %84 = dma.done.wait [#allocation3], 256  }
   0xd   :  { %85 = vsyncadd [#allocation3], 4294967040  ;;  %s89_s11 = smov [#allocation5]   ;;  %v21_v0 = vld [vmem:[#allocation2] sm:$0xff]  ;;  %v22_v1 = vld [vmem:[#allocation2 + $0x8] sm:$0xff] }
   0xe   :  { %s33_s12 = sshll.u32 %s89_s11, 4  ;;  %v23_v2 = vmul.f32 0.003921569, %v21_v0  ;;  %v24_v3 = vmul.f32 0.003921569, %v22_v1  ;;  %s34_s12 = int_to_ptr.vmem [resolvable:$true] %s33_s12 }
   0xf   :  { %s64_s13 = scalar_lea.vmem %s34_s12, 256  ;;  %p69_p6 = scmp.lt.s32.totalorder %s34_s12, %s34_s12 }
  0x10   :  { %25 = vst [vmem:[#allocation5] sm:$0xff] %v23_v2  ;;  %26 = vst [vmem:[#allocation5 + $0x8] sm:$0xff] %v24_v3  ;;  %p65_p5 = scmp.ne.s32.totalorder %s34_s12, %s64_s13  ;;  %p70_p7 = scmp.lt.s32.totalorder %s64_s13, %s64_s13 }
  0x12   :  { %p71_p8 = por %p70_p7, %p69_p6 }
  0x14   :  { %p72_p9 = pnand %p71_p8, %p65_p5 }
  0x16   :  { %75 = shalt.err (!%p72_p9)
}
  0x17   :  { %36 = dma.vmem_to_hbm [thread:$0]  %s34_s12, 256, %s107_s1, [#allocation4]  }
  0x18   :  { %86 = dma.done.wait [#allocation4], 256  }
  0x19   :  { %87 = vsyncadd [#allocation4], 4294967040 }
  0x1a   :  { %40 = vsyncpa [#allocation3], 1 }
  0x1b   :  { %41 = vsyncpa [#allocation4], 1 }

</bundles_post_ra>
